<compile_context>
chip_gen: v7x
topology: tpu7x:2x2x1
jax: 0.10.0
libtpu: 0.0.40
codegen_flags: <defaults>
</compile_context>

<pallas_src>
import functools

import jax
import jax.numpy as jnp
from jax import lax
from jax.experimental import pallas as pl
from jax.experimental.pallas import tpu as pltpu


def _round_up(x, m):
    return ((x + m - 1) // m) * m


def _round_down(x, m):
    return (x // m) * m


# ---------------------------------------------------------------------------
# Kernel 1: global average pooling over channels-last (N, HW, C) blocks.
# Grid = (batch tiles ["parallel"], spatial tiles ["arbitrary"]).  Each batch
# tile's pooled sum accumulates directly in its resident (n_block, C) output
# block (output index map is constant along the spatial axis), so the batch
# axis is megacore-shardable on v7x.  Ragged spatial tiles are masked here.
# ---------------------------------------------------------------------------
def _pool_kernel(x_ref, pool_ref, *, hw, hw_tile, inv_hw):
    l = pl.program_id(1)
    nl = pl.num_programs(1)

    x = x_ref[...]                                        # (n_block, hw_tile, C)
    if hw % hw_tile != 0:                                 # static: ragged last tile
        pos = l * hw_tile + lax.broadcasted_iota(jnp.int32, x.shape, 1)
        x = jnp.where(pos < hw, x, jnp.zeros((), x.dtype))
    # f32 accumulation without materializing a full upcast copy of the tile;
    # the result is already lane-dense in C (VALU adds across sublane rows).
    partial = jnp.sum(x, axis=1, dtype=jnp.float32)       # (n_block, C)

    @pl.when(l == 0)
    def _init():
        pool_ref[...] = partial

    @pl.when(l > 0)
    def _accumulate():
        pool_ref[...] += partial

    @pl.when(l == nl - 1)
    def _finalize():
        pool_ref[...] *= inv_hw


# ---------------------------------------------------------------------------
# Kernel 2: tiny full-batch neck micro-kernel (single grid step).
# ---------------------------------------------------------------------------
def _neck_kernel(pool_ref, bn_g_ref, bn_b_ref, in_b_ref, neck_ref,
                 *, n_valid, bn_eps):
    pool = pool_ref[...]                                  # (N, C) f32
    # bottleneck1: BatchNorm2d (training mode) on the (N, C, 1, 1) pooled
    # feature -> per-channel batch statistics (biased variance).
    mu = jnp.mean(pool, axis=0, keepdims=True)
    var = jnp.mean(jnp.square(pool - mu), axis=0, keepdims=True)
    neck = (pool - mu) * lax.rsqrt(var + bn_eps)
    neck = neck * bn_g_ref[...] + bn_b_ref[...]
    # bottleneck2: InstanceNorm2d(affine) over a 1x1 spatial map reduces
    # exactly to its beta ((x - x) * rsqrt(0 + eps) * g + b == b), so the
    # 'sum' aggregation is just "+ in_beta" (dead arithmetic removed).
    neck = (neck + in_b_ref[...]).astype(neck_ref.dtype)
    if n_valid == neck_ref.shape[0]:
        neck_ref[...] = neck
    else:
        # Zero rows [n_valid:Np8) keep kernel-3 output stores sublane-aligned
        # and yield zero logits that are sliced off in the wrapper.
        neck_ref[...] = jnp.zeros_like(neck_ref)
        neck_ref[0:n_valid, :] = neck


# ---------------------------------------------------------------------------
# Kernel 3: classifier matmul, class-tiled, bf16 operands / f32 accumulate.
# ---------------------------------------------------------------------------
def _classifier_kernel(neck_ref, wt_ref, cls_ref):
    # any_softmax.Linear is identity on logits.
    cls_ref[...] = jnp.dot(neck_ref[...], wt_ref[...],
                           preferred_element_type=jnp.float32)
    # TODO(synk): margin-based softmax variants (Arc/Cos/CircleSoftmax with
    # F.normalize on both operands) and agg_type == 'cat' are not implemented.
    # TODO(synk): optional int8 (v5e/v6e) / fp8 (v7x) weight quantization to
    # halve the dominant weight-read bytes is not implemented.


def embedding_agg_head_forward(features, params, *, scale=16.0, bn_eps=1e-5,
                               data_format="NCHW", n_block=None, hw_tile=None,
                               class_tile=None):
    if data_format == "NCHW":
        n, c, h, w = features.shape
        # The one remaining activation-sized copy: channels-last layout makes
        # the pooled reduce VALU-only with a lane-dense (N, C) result (needed
        # on v7x where an XLU reduce would be exposed).  Feed NHWC from the
        # backbone (data_format="NHWC") to skip this copy entirely; no padding
        # of the activation tensor is ever performed.
        x = jnp.transpose(features, (0, 2, 3, 1)).reshape(n, h * w, c)
    elif data_format == "NHWC":
        n, h, w, c = features.shape
        x = features.reshape(n, h * w, c)
    else:
        raise ValueError(f"unsupported data_format: {data_format}")
    hw = h * w
    num_classes = params["cls_weight"].shape[0]
    itemsize = jnp.dtype(x.dtype).itemsize
    mib = 1024 * 1024

    # ---- generation-aware VMEM budgeting (v7x: 64 MiB/TC, v5e/v6e: 128 MiB) --
    try:
        vmem_cap = int(pltpu.get_tpu_info().vmem_capacity_bytes)
    except Exception:  # conservative fallback
        vmem_cap = 64 * mib
    small_vmem = vmem_cap <= 80 * mib
    block_budget = (10 if small_vmem else 28) * mib     # per streaming buffer (x2 dbl-buf)
    vmem_limit = (52 if small_vmem else 96) * mib
    weight_budget = (16 if small_vmem else 32) * mib

    # ---- kernel-1 tiling: (n_block, hw_tile, C) channels-last blocks --------
    # Constraints: n_block multiple of 8 or == n; hw_tile multiple of 8 or == hw.
    pos_bytes = c * itemsize
    if n_block is None or hw_tile is None:
        rows_in_budget = max(1, block_budget // max(hw * pos_bytes, 1))
        if rows_in_budget >= n:
            auto_nb, auto_ht = n, hw
        elif rows_in_budget >= 8:
            auto_nb, auto_ht = _round_down(rows_in_budget, 8), hw
        else:
            auto_nb = n if n < 8 else 8
            auto_ht = max(8, _round_down(block_budget // (auto_nb * pos_bytes), 8))
            if auto_ht >= hw:
                auto_ht = hw
        if small_vmem and n >= 16 and auto_nb >= n:
            # >= 2 batch tiles so both v7x TensorCores can pull HBM in parallel.
            auto_nb = max(8, _round_down(pl.cdiv(n, 2), 8))
    if n_block is None:
        n_block = auto_nb
    else:
        n_block = n if n_block >= n else max(8, _round_down(n_block, 8))
    if hw_tile is None:
        hw_tile = auto_ht
    else:
        hw_tile = hw if hw_tile >= hw else max(8, _round_down(hw_tile, 8))
    ni = pl.cdiv(n, n_block)
    nl = pl.cdiv(hw, hw_tile)

    f32 = jnp.float32
    bn_g = params["bn_gamma"].astype(f32).reshape(1, c)
    bn_b = params["bn_beta"].astype(f32).reshape(1, c)
    # in_gamma is mathematically dead: IN over a 1x1 spatial map multiplies it by 0.
    in_b = params["in_beta"].astype(f32).reshape(1, c)

    # ---- kernel 1: pooled features (the 'features' output, neck_feat='before')
    pool = pl.pallas_call(
        functools.partial(_pool_kernel, hw=hw, hw_tile=hw_tile,
                          inv_hw=1.0 / float(hw)),
        out_shape=jax.ShapeDtypeStruct((n, c), jnp.float32),
        grid_spec=pltpu.PrefetchScalarGridSpec(
            num_scalar_prefetch=0,
            grid=(ni, nl),
            in_specs=[pl.BlockSpec((n_block, hw_tile, c),
                                   lambda i, l: (i, l, 0))],
            out_specs=pl.BlockSpec((n_block, c), lambda i, l: (i, 0))),
        compiler_params=pltpu.CompilerParams(
            dimension_semantics=("parallel", "arbitrary"),
            vmem_limit_bytes=vmem_limit),
    )(x)

    # ---- kernel 2: full-batch BN + "+in_beta" neck (bf16, rows padded to 8) --
    np8 = _round_up(n, 8)
    neck = pl.pallas_call(
        functools.partial(_neck_kernel, n_valid=n, bn_eps=float(bn_eps)),
        out_shape=jax.ShapeDtypeStruct((np8, c), jnp.bfloat16),
        grid_spec=pltpu.PrefetchScalarGridSpec(
            num_scalar_prefetch=0,
            grid=(1,),
            in_specs=[pl.BlockSpec((n, c), lambda i: (0, 0)),
                      pl.BlockSpec((1, c), lambda i: (0, 0)),
                      pl.BlockSpec((1, c), lambda i: (0, 0)),
                      pl.BlockSpec((1, c), lambda i: (0, 0))],
            out_specs=pl.BlockSpec((np8, c), lambda i: (0, 0))),
        compiler_params=pltpu.CompilerParams(
            dimension_semantics=("arbitrary",),
            vmem_limit_bytes=vmem_limit),
    )(pool, bn_g, bn_b, in_b)

    # ---- kernel 3: class-tiled classifier ------------------------------------
    ncp = _round_up(num_classes, 128)
    if class_tile is None:
        class_tile = 2048
    class_tile = max(128, min(_round_up(class_tile, 128), ncp))
    # Keep the double-buffered (C, class_tile) bf16 weight block within budget.
    while class_tile > 128 and 2 * c * class_tile * 2 > weight_budget:
        class_tile = max(128, _round_up(class_tile // 2, 128))
    ncp = _round_up(ncp, class_tile)
    nj = ncp // class_tile

    # Classifier weight pre-transposed to (C, NCp), cast to bf16 (native MXU
    # path, half the weight-read bytes); zero-padded classes are sliced off.
    wt = jnp.pad(params["cls_weight"].astype(jnp.bfloat16).T,
                 ((0, 0), (0, ncp - num_classes)))

    cls_p = pl.pallas_call(
        _classifier_kernel,
        out_shape=jax.ShapeDtypeStruct((np8, ncp), jnp.float32),
        grid_spec=pltpu.PrefetchScalarGridSpec(
            num_scalar_prefetch=0,
            grid=(nj,),
            in_specs=[pl.BlockSpec((np8, c), lambda j: (0, 0)),
                      pl.BlockSpec((c, class_tile), lambda j: (0, j))],
            out_specs=pl.BlockSpec((np8, class_tile), lambda j: (0, j))),
        compiler_params=pltpu.CompilerParams(
            dimension_semantics=("parallel",),
            vmem_limit_bytes=vmem_limit),
    )(neck, wt)

    cls_out = cls_p[:n, :num_classes]
    # pred_class_logits is only a scaled copy (metrics): computed lazily here
    # instead of writing a duplicate f32 (N, NCp) array from the kernel.
    return {"cls_outputs": cls_out,
            "pred_class_logits": cls_out * scale,
            "features": pool}


def _ref_forward(x_nchw, params, scale, bn_eps):
    """Plain-JAX reference of the PyTorch forward (training, Linear cls),
    mirroring the kernel's bf16 matmul operands with f32 accumulation."""
    xf = x_nchw.astype(jnp.float32)
    pool = jnp.mean(xf, axis=(2, 3))                                 # (N, C)
    mu = jnp.mean(pool, axis=0, keepdims=True)
    var = jnp.mean(jnp.square(pool - mu), axis=0, keepdims=True)     # biased
    n1 = (pool - mu) * lax.rsqrt(var + bn_eps)
    n1 = n1 * params["bn_gamma"][None, :] + params["bn_beta"][None, :]
    # InstanceNorm2d over a 1x1 spatial map: (x - x)*rsqrt(0+eps)*g + b == b
    neck = n1 + params["in_beta"][None, :]
    logits = jnp.dot(neck.astype(jnp.bfloat16),
                     params["cls_weight"].astype(jnp.bfloat16).T,
                     preferred_element_type=jnp.float32)
    return logits, logits * scale, pool


if __name__ == "__main__":
    # Small shapes that still exercise: C not a multiple of 128 (full-C,
    # no-pad blocks), batch rows padded 6 -> 8 for the classifier, class
    # padding 200 -> 256, and (second call) the masked multi-spatial-tile
    # reduction plus multiple class tiles.
    N, C, H, W = 6, 96, 16, 18           # HW = 288
    NUM_CLASSES = 200
    SCALE = 16.0

    key = jax.random.PRNGKey(0)
    kx, kw, kg1, kb1, kg2, kb2 = jax.random.split(key, 6)

    features = jax.random.normal(kx, (N, C, H, W), dtype=jnp.float32)

    # Shapes match the module: BN2d/IN2d affine params are (C,), classifier
    # weight is (num_classes, C) with std=0.01 normal init.  Norm affine
    # params are perturbed around the module's (1, 0) init.
    params = {
        "bn_gamma": 1.0 + 0.1 * jax.random.normal(kg1, (C,), dtype=jnp.float32),
        "bn_beta": 0.1 * jax.random.normal(kb1, (C,), dtype=jnp.float32),
        "in_gamma": 1.0 + 0.1 * jax.random.normal(kg2, (C,), dtype=jnp.float32),
        "in_beta": 0.1 * jax.random.normal(kb2, (C,), dtype=jnp.float32),
        "cls_weight": 0.01 * jax.random.normal(kw, (NUM_CLASSES, C),
                                               dtype=jnp.float32),
    }

    ref_cls, ref_pcl, ref_feat = _ref_forward(features, params, SCALE, 1e-5)

    def _check(out):
        return (jnp.allclose(out["cls_outputs"], ref_cls, atol=5e-3, rtol=1e-2) and
                jnp.allclose(out["pred_class_logits"], ref_pcl, atol=5e-2, rtol=1e-2) and
                jnp.allclose(out["features"], ref_feat, atol=1e-5, rtol=1e-5))

    # 1) auto, generation-aware tiling.
    out_auto = embedding_agg_head_forward(features, params, scale=SCALE)
    jax.block_until_ready(out_auto)

    # 2) forced small tiles: ragged masked spatial reduction (288 = 2x128 + 32)
    #    and two class tiles (256 = 2x128).
    out_tiled = embedding_agg_head_forward(features, params, scale=SCALE,
                                           hw_tile=128, class_tile=128)
    jax.block_until_ready(out_tiled)

    if bool(_check(out_auto)) and bool(_check(out_tiled)):
        print("KERNEL_OK")
    else:
        raise SystemExit("mismatch vs. plain-JAX reference")
</pallas_src>

<mosaic_0001>
module attributes {stable_mosaic.version = 11 : i64} {
  func.func @_pool_kernel(%arg0: i32, %arg1: i32, %arg2: memref<6x288x96xf32, #tpu.memory_space<vmem>>, %arg3: memref<6x96xf32, #tpu.memory_space<vmem>>) attributes {dimension_semantics = [#tpu.dimension_semantics<parallel>, #tpu.dimension_semantics<arbitrary>], iteration_bounds = array<i64: 1, 1>, scalar_prefetch = 0 : i64, scratch_operands = 0 : i64, tpu.core_type = #tpu.core_type<tc>, window_params = [{transform_indices = @transform_0, window_bounds = array<i64: 6, 288, 96>}, {transform_indices = @transform_1, window_bounds = array<i64: 6, 96>}]} {
    %c0 = arith.constant 0 : index
    %c0_0 = arith.constant 0 : index
    %c0_1 = arith.constant 0 : index
    %0 = vector.load %arg2[%c0, %c0_0, %c0_1] : memref<6x288x96xf32, #tpu.memory_space<vmem>>, vector<6x288x96xf32>
    %cst = arith.constant dense<0.000000e+00> : vector<6x96xf32>
    %1 = vector.multi_reduction <add>, %0, %cst [1] : vector<6x288x96xf32> to vector<6x96xf32>
    %c0_i32 = arith.constant 0 : i32
    %2 = arith.cmpi eq, %arg1, %c0_i32 : i32
    %3 = arith.extui %2 : i1 to i32
    %c0_i32_2 = arith.constant 0 : i32
    %4 = arith.cmpi ne, %3, %c0_i32_2 : i32
    scf.if %4 {
      %c0_7 = arith.constant 0 : index
      %c0_8 = arith.constant 0 : index
      %11 = vector.load %arg3[%c0_7, %c0_8] : memref<6x96xf32, #tpu.memory_space<vmem>>, vector<6x96xf32>
      tpu.vector_store %arg3[%c0_7, %c0_8], %1 {strides = array<i32>} : memref<6x96xf32, #tpu.memory_space<vmem>>, vector<6x96xf32>,
    } else {
    }
    %c0_i32_3 = arith.constant 0 : i32
    %5 = arith.cmpi sgt, %arg1, %c0_i32_3 : i32
    %6 = arith.extui %5 : i1 to i32
    %c0_i32_4 = arith.constant 0 : i32
    %7 = arith.cmpi ne, %6, %c0_i32_4 : i32
    scf.if %7 {
      %c0_7 = arith.constant 0 : index
      %c0_8 = arith.constant 0 : index
      %11 = vector.load %arg3[%c0_7, %c0_8] : memref<6x96xf32, #tpu.memory_space<vmem>>, vector<6x96xf32>
      %12 = arith.addf %11, %1 : vector<6x96xf32>
      %c0_9 = arith.constant 0 : index
      %c0_10 = arith.constant 0 : index
      %13 = vector.load %arg3[%c0_9, %c0_10] : memref<6x96xf32, #tpu.memory_space<vmem>>, vector<6x96xf32>
      tpu.vector_store %arg3[%c0_9, %c0_10], %12 {strides = array<i32>} : memref<6x96xf32, #tpu.memory_space<vmem>>, vector<6x96xf32>,
    } else {
    }
    %c0_i32_5 = arith.constant 0 : i32
    %8 = arith.cmpi eq, %arg1, %c0_i32_5 : i32
    %9 = arith.extui %8 : i1 to i32
    %c0_i32_6 = arith.constant 0 : i32
    %10 = arith.cmpi ne, %9, %c0_i32_6 : i32
    scf.if %10 {
      %c0_7 = arith.constant 0 : index
      %c0_8 = arith.constant 0 : index
      %11 = vector.load %arg3[%c0_7, %c0_8] : memref<6x96xf32, #tpu.memory_space<vmem>>, vector<6x96xf32>
      %cst_9 = arith.constant 0.00347222225 : f32
      %12 = vector.broadcast %cst_9 : f32 to vector<6x96xf32>
      %13 = arith.mulf %11, %12 : vector<6x96xf32>
      %c0_10 = arith.constant 0 : index
      %c0_11 = arith.constant 0 : index
      %14 = vector.load %arg3[%c0_10, %c0_11] : memref<6x96xf32, #tpu.memory_space<vmem>>, vector<6x96xf32>
      tpu.vector_store %arg3[%c0_10, %c0_11], %13 {strides = array<i32>} : memref<6x96xf32, #tpu.memory_space<vmem>>, vector<6x96xf32>,
    } else {
    }
    return
  }
  func.func @transform_0(%arg0: i32, %arg1: i32) -> (i32, i32, i32) {
    %c0_i32 = arith.constant 0 : i32
    %c0_i32_0 = arith.constant 0 : i32
    return %arg0, %arg1, %c0_i32 : i32, i32, i32
  }
  func.func @transform_1(%arg0: i32, %arg1: i32) -> (i32, i32) {
    %c0_i32 = arith.constant 0 : i32
    %c0_i32_0 = arith.constant 0 : i32
    return %arg0, %c0_i32 : i32, i32
  }
}

</mosaic_0001>

<bundles_post_ra>
// kernel: tpu_custom_call.1
= control target key start
LH: loop header
LB: loop body
LE: loop exit
PB: predicated region body
PF: predicated region fallthrough
CT: control target
= control target key end

     0   :  { %6 = vsyncpa [#allocation3], 0  ;;  %s1078_s0 = inlined_call_operand.hbm [shape: f32[6,288,96], index: 0, kind: input, shape index: {}]   ;;  %s1079_s1 = inlined_call_operand.hbm [shape: f32[6,96], index: 1, kind: output, shape index: {}]  }
   0x1   :  { %7 = vsyncpa [#allocation4], 0  ;;  %s824_s6 = smov [#allocation2]   ;;  %s776_s10 = scalar_lea.hbm %s1078_s0, 27648 }
   0x2   :  { %s13_s7 = sshll.u32 %s824_s6, 4  ;;  %p777_p0 = scmp.ne.s32.totalorder %s1078_s0, %s776_s10  ;;  %s14_s7 = int_to_ptr.vmem [resolvable:$true] %s13_s7 }
   0x3   :  { %p780_p1 = scmp.lt.u32.totalorder %s776_s10, %s1078_s0 }
   0x5   :  { %p782_p2 = pnand %p780_p1, %p777_p0 }
   0x7   :  { %785 = shalt.err (!%p782_p2)
}
   0x8   :  { %s786_s15 = scalar_lea.vmem %s14_s7, 27648  ;;  %p791_p4 = scmp.lt.s32.totalorder %s14_s7, %s14_s7 }
   0x9   :  { %p787_p3 = scmp.ne.s32.totalorder %s14_s7, %s786_s15  ;;  %p792_p5 = scmp.lt.s32.totalorder %s786_s15, %s786_s15 }
   0xb   :  { %p793_p6 = por %p792_p5, %p791_p4 }
   0xd   :  { %p794_p7 = pnand %p793_p6, %p787_p3 }
   0xf   :  { %797 = shalt.err (!%p794_p7)
}
  0x10   :  { %s825_s16 = smov 128   ;;  %s826_s17 = smov 8  }
  0x11   :  { %19 = dma.hbm_to_vmem [thread:$0]  %s1078_s0, 27648, %s14_s7, [#allocation3], %s825_s16, %s825_s16, %s826_s17  }
  0x12   :  { %820 = dma.done.wait [#allocation3], 27648  }
  0x13   :  { %821 = vsyncadd [#allocation3], 4294939648  ;;  %vm239_vm0 = vcmask 785408   ;;  %v23_v0 = vld [vmem:[#allocation2] sm:$0xff]  ;;  %v24_v1 = vld [vmem:[#allocation2 + $0x8] sm:$0xff]  ;;  %vm712_vm1 = vcmask 1041409  }
  0x14   :  { %v25_v2 = vld [vmem:[#allocation2 + $0x10] sm:$0xff]  ;;  %v26_v3 = vld [vmem:[#allocation2 + $0x18] sm:$0xff]  ;;  %v240_v4 = vsel %vm239_vm0, %v23_v0, 0.0  ;;  %v241_v5 = vsel %vm239_vm0, %v24_v1, 0.0  ;;  %v27_v8 = vld [vmem:[#allocation2 + $0x20] sm:$0xff]  ;;  %vm714_vm2 = vcmask 1042434  }
  0x15   :  { %v243_v6 = vsel %vm239_vm0, %v25_v2, 0.0  ;;  %v242_v7 = vadd.f32 %v241_v5, %v240_v4  ;;  %v245_v9 = vsel %vm239_vm0, %v26_v3, 0.0  ;;  %v247_v12 = vsel %vm239_vm0, %v27_v8, 0.0  ;;  %v28_v13 = vld [vmem:[#allocation2 + $0x28] sm:$0xff]  ;;  %v29_v16 = vld [vmem:[#allocation2 + $0x30] sm:$0xff]  ;;  %v59_v17 = vld [vmem:[#allocation2 + $0x120] sm:$0xff] }
  0x16   :  { %v249_v15 = vsel %vm239_vm0, %v28_v13, 0.0  ;;  %v60_v18 = vld [vmem:[#allocation2 + $0x128] sm:$0xff]  ;;  %v61_v19 = vld [vmem:[#allocation2 + $0x130] sm:$0xff]  ;;  %v62_v20 = vld [vmem:[#allocation2 + $0x138] sm:$0xff]  ;;  %v317_v22 = vsel %vm239_vm0, %v59_v17, 0.0  ;;  %v251_v26 = vsel %vm239_vm0, %v29_v16, 0.0 }
  0x17   :  { %v244_v10 = vadd.f32 %v243_v6, %v242_v7  ;;  %v318_v23 = vsel %vm239_vm0, %v60_v18, 0.0  ;;  %v320_v24 = vsel %vm239_vm0, %v61_v19, 0.0  ;;  %v63_v25 = vld [vmem:[#allocation2 + $0x140] sm:$0xff]  ;;  %v30_v28 = vld [vmem:[#allocation2 + $0x38] sm:$0xff]  ;;  %v322_v29 = vsel %vm239_vm0, %v62_v20, 0.0  ;;  %v64_v30 = vld [vmem:[#allocation2 + $0x148] sm:$0xff] }
  0x18   :  { %v319_v27 = vadd.f32 %v318_v23, %v317_v22  ;;  %v324_v33 = vsel %vm239_vm0, %v63_v25, 0.0  ;;  %v65_v34 = vld [vmem:[#allocation2 + $0x150] sm:$0xff]  ;;  %v253_v35 = vsel %vm239_vm0, %v30_v28, 0.0  ;;  %v31_v37 = vld [vmem:[#allocation2 + $0x40] sm:$0xff]  ;;  %v326_v38 = vsel %vm239_vm0, %v64_v30, 0.0  ;;  %v66_v39 = vld [vmem:[#allocation2 + $0x158] sm:$0xff] }
  0x19   :  { %v246_v11 = vadd.f32 %v245_v9, %v244_v10  ;;  %v328_v42 = vsel %vm239_vm0, %v65_v34, 0.0  ;;  %v67_v43 = vld [vmem:[#allocation2 + $0x160] sm:$0xff]  ;;  %v255_v44 = vsel %vm239_vm0, %v31_v37, 0.0  ;;  %v32_v46 = vld [vmem:[#allocation2 + $0x48] sm:$0xff]  ;;  %v330_v47 = vsel %vm239_vm0, %v66_v39, 0.0  ;;  %v97_v52 = vld [vmem:[#allocation2 + $0x250] sm:$0xff] }
  0x1a   :  { %v321_v31 = vadd.f32 %v320_v24, %v319_v27  ;;  %v68_v48 = vld [vmem:[#allocation2 + $0x168] sm:$0xff]  ;;  %v95_v49 = vld [vmem:[#allocation2 + $0x240] sm:$0xff]  ;;  %v332_v54 = vsel %vm239_vm0, %v67_v43, 0.0  ;;  %v98_v55 = vld [vmem:[#allocation2 + $0x258] sm:$0xff]  ;;  %v257_v56 = vsel %vm239_vm0, %v32_v46, 0.0  ;;  %v397_v2 = vsel %vm239_vm0, %v97_v52, 0.0 }
  0x1b   :  { %v248_v14 = vadd.f32 %v247_v12, %v246_v11  ;;  %v96_v50 = vld [vmem:[#allocation2 + $0x248] sm:$0xff]  ;;  %v33_v58 = vld [vmem:[#allocation2 + $0x50] sm:$0xff]  ;;  %v334_v59 = vsel %vm239_vm0, %v68_v48, 0.0  ;;  %v394_v60 = vsel %vm239_vm0, %v95_v49, 0.0  ;;  %v99_v63 = vld [vmem:[#allocation2 + $0x260] sm:$0xff]  ;;  %v399_v4 = vsel %vm239_vm0, %v98_v55, 0.0 }
  0x1c   :  { %v323_v36 = vadd.f32 %v322_v29, %v321_v31  ;;  %v395_v61 = vsel %vm239_vm0, %v96_v50, 0.0  ;;  %v69_v62 = vld [vmem:[#allocation2 + $0x170] sm:$0xff]  ;;  %v100_v5 = vld [vmem:[#allocation2 + $0x268] sm:$0xff]  ;;  %v259_v6 = vsel %vm239_vm0, %v33_v58, 0.0  ;;  %v34_v9 = vld [vmem:[#allocation2 + $0x58] sm:$0xff]  ;;  %v401_v11 = vsel %vm239_vm0, %v99_v63, 0.0 }
  0x1d   :  { %v250_v21 = vadd.f32 %v249_v15, %v248_v14  ;;  %v396_v1 = vadd.f32 %v395_v61, %v394_v60  ;;  %v336_v10 = vsel %vm239_vm0, %v69_v62, 0.0  ;;  %v70_v12 = vld [vmem:[#allocation2 + $0x178] sm:$0xff]  ;;  %v101_v13 = vld [vmem:[#allocation2 + $0x270] sm:$0xff]  ;;  %v403_v16 = vsel %vm239_vm0, %v100_v5, 0.0  ;;  %v71_v24 = vld [vmem:[#allocation2 + $0x180] sm:$0xff]  ;;  %s827_s0 = smov [#allocation5]  }
  0x1e   :  { %v325_v40 = vadd.f32 %v324_v33, %v323_v36  ;;  %v102_v17 = vld [vmem:[#allocation2 + $0x278] sm:$0xff]  ;;  %v261_v18 = vsel %vm239_vm0, %v34_v9, 0.0  ;;  %v338_v22 = vsel %vm239_vm0, %v70_v12, 0.0  ;;  %v405_v23 = vsel %vm239_vm0, %v101_v13, 0.0  ;;  %v103_v25 = vld [vmem:[#allocation2 + $0x280] sm:$0xff]  ;;  %v104_v29 = vld [vmem:[#allocation2 + $0x288] sm:$0xff] }
  0x1f   :  { %v252_v32 = vadd.f32 %v251_v26, %v250_v21  ;;  %v398_v8 = vadd.f32 %v397_v2, %v396_v1  ;;  %v35_v21 = vld [vmem:[#allocation2 + $0x60] sm:$0xff]  ;;  %v407_v28 = vsel %vm239_vm0, %v102_v17, 0.0  ;;  %v36_v33 = vld [vmem:[#allocation2 + $0x68] sm:$0xff]  ;;  %v340_v34 = vsel %vm239_vm0, %v71_v24, 0.0  ;;  %v105_v37 = vld [vmem:[#allocation2 + $0x290] sm:$0xff]  ;;  %s763_s20 = sshll.u32 %s827_s0, 4  ;;  %s764_s20 = int_to_ptr.vmem [resolvable:$true] %s763_s20 }
  0x20   :  { %v327_v45 = vadd.f32 %v326_v38, %v325_v40  ;;  %v263_v30 = vsel %vm239_vm0, %v35_v21, 0.0  ;;  %v72_v36 = vld [vmem:[#allocation2 + $0x188] sm:$0xff]  ;;  %v411_v40 = vsel %vm239_vm0, %v104_v29, 0.0  ;;  %v73_v48 = vld [vmem:[#allocation2 + $0x190] sm:$0xff]  ;;  %v413_v50 = vsel %vm239_vm0, %v105_v37, 0.0  ;;  %v135_v60 = vld [vmem:[#allocation2 + $0x380] sm:$0xff]  ;;  %p803_p9 = scmp.lt.s32.totalorder %s764_s20, %s764_s20 }
  0x21   :  { %v254_v41 = vadd.f32 %v253_v35, %v252_v32  ;;  %v400_v14 = vadd.f32 %v399_v4, %v398_v8  ;;  %v409_v35 = vsel %vm239_vm0, %v103_v25, 0.0  ;;  %v132_v43 = vld [vmem:[#allocation2 + $0x368] sm:$0xff]  ;;  %v342_v49 = vsel %vm239_vm0, %v72_v36, 0.0  ;;  %v133_v52 = vld [vmem:[#allocation2 + $0x370] sm:$0xff]  ;;  %v38_v1 = vld [vmem:[#allocation2 + $0x78] sm:$0xff]  ;;  %s798_s21 = scalar_lea.vmem %s764_s20, 128 }
  0x22   :  { %v329_v51 = vadd.f32 %v328_v42, %v327_v45  ;;  %v131_v42 = vld [vmem:[#allocation2 + $0x360] sm:$0xff]  ;;  %v472_v58 = vsel %vm239_vm0, %v132_v43, 0.0  ;;  %v344_v2 = vsel %vm239_vm0, %v73_v48, 0.0  ;;  %v474_v4 = vsel %vm239_vm0, %v133_v52, 0.0  ;;  %v136_v8 = vld [vmem:[#allocation2 + $0x388] sm:$0xff]  ;;  %v138_v25 = vld [vmem:[#allocation2 + $0x398] sm:$0xff]  ;;  %p799_p8 = scmp.ne.s32.totalorder %s764_s20, %s798_s21  ;;  %p804_p10 = scmp.lt.s32.totalorder %s798_s21, %s798_s21 }
  0x23   :  { %v256_v53 = vadd.f32 %v255_v44, %v254_v41  ;;  %v402_v20 = vadd.f32 %v401_v11, %v400_v14  ;;  %v106_v41 = vld [vmem:[#allocation2 + $0x298] sm:$0xff]  ;;  %v265_v44 = vsel %vm239_vm0, %v36_v33, 0.0  ;;  %v478_v13 = vsel %vm239_vm0, %v135_v60, 0.0  ;;  %v137_v14 = vld [vmem:[#allocation2 + $0x390] sm:$0xff]  ;;  %v75_v24 = vld [vmem:[#allocation2 + $0x1a0] sm:$0xff] }
  0x24   :  { %v331_v57 = vadd.f32 %v330_v47, %v329_v51  ;;  %v37_v47 = vld [vmem:[#allocation2 + $0x70] sm:$0xff]  ;;  %v107_v51 = vld [vmem:[#allocation2 + $0x2a0] sm:$0xff]  ;;  %v482_v29 = vsel %vm239_vm0, %v137_v14, 0.0  ;;  %v348_v37 = vsel %vm239_vm0, %v75_v24, 0.0  ;;  %v168_v14 = vld [vmem:[#allocation2 + $0x488] sm:$0xff]  ;;  %vm716_vm3 = vcmask 1043459   ;;  %p805_p11 = por %p804_p10, %p803_p9 }
  0x25   :  { %v258_v3 = vadd.f32 %v257_v56, %v256_v53  ;;  %v404_v26 = vadd.f32 %v403_v16, %v402_v20  ;;  %v134_v53 = vld [vmem:[#allocation2 + $0x378] sm:$0xff]  ;;  %v415_v56 = vsel %vm239_vm0, %v106_v41, 0.0  ;;  %v267_v61 = vsel %vm239_vm0, %v37_v47, 0.0  ;;  %v140_v41 = vld [vmem:[#allocation2 + $0x3a8] sm:$0xff]  ;;  %v143_v60 = vld [vmem:[#allocation2 + $0x3c0] sm:$0xff] }
  0x26   :  { %v333_v0 = vadd.f32 %v332_v54, %v331_v57  ;;  %v471_v57 = vsel %vm239_vm0, %v131_v42, 0.0  ;;  %v476_v5 = vsel %vm239_vm0, %v134_v53, 0.0  ;;  %v488_v53 = vsel %vm239_vm0, %v140_v41, 0.0  ;;  %v146_v24 = vld [vmem:[#allocation2 + $0x3d8] sm:$0xff]  ;;  %p806_p12 = pnand %p805_p11, %p799_p8 }
  0x27   :  { %v260_v15 = vadd.f32 %v259_v6, %v258_v3  ;;  %v406_v32 = vadd.f32 %v405_v23, %v404_v26  ;;  %v417_v3 = vsel %vm239_vm0, %v107_v51, 0.0  ;;  %v74_v6 = vld [vmem:[#allocation2 + $0x198] sm:$0xff]  ;;  %v39_v23 = vld [vmem:[#allocation2 + $0x80] sm:$0xff]  ;;  %v500_v41 = vsel %vm239_vm0, %v146_v24, 0.0  ;;  %v152_v24 = vld [vmem:[#allocation2 + $0x408] sm:$0xff] }
  0x28   :  { %v335_v7 = vadd.f32 %v334_v59, %v333_v0  ;;  %v108_v59 = vld [vmem:[#allocation2 + $0x2a8] sm:$0xff]  ;;  %v473_v0 = vadd.f32 %v472_v58, %v471_v57  ;;  %v346_v20 = vsel %vm239_vm0, %v74_v6, 0.0  ;;  %v271_v36 = vsel %vm239_vm0, %v39_v23, 0.0  ;;  %v78_v6 = vld [vmem:[#allocation2 + $0x1b8] sm:$0xff]  ;;  %v79_v23 = vld [vmem:[#allocation2 + $0x1c0] sm:$0xff] }
  0x29   :  { %v262_v27 = vadd.f32 %v261_v18, %v260_v15  ;;  %v408_v38 = vadd.f32 %v407_v28, %v406_v32  ;;  %v419_v12 = vsel %vm239_vm0, %v108_v59, 0.0  ;;  %v269_v15 = vsel %vm239_vm0, %v38_v1, 0.0  ;;  %v113_v1 = vld [vmem:[#allocation2 + $0x2d0] sm:$0xff] }
  0x2a   :  { %v337_v19 = vadd.f32 %v336_v10, %v335_v7  ;;  %v109_v7 = vld [vmem:[#allocation2 + $0x2b0] sm:$0xff]  ;;  %v475_v10 = vadd.f32 %v474_v4, %v473_v0  ;;  %vm718_vm4 = vcmask 1044484   ;;  %vm720_vm5 = vcmask 1045509  }
  0x2b   :  { %v264_v39 = vadd.f32 %v263_v30, %v262_v27  ;;  %v410_v46 = vadd.f32 %v409_v35, %v408_v38  ;;  %v421_v21 = vsel %vm239_vm0, %v109_v7, 0.0  ;;  %v139_v30 = vld [vmem:[#allocation2 + $0x3a0] sm:$0xff]  ;;  %v484_v38 = vsel %vm239_vm0, %v138_v25, 0.0  ;;  %v144_v7 = vld [vmem:[#allocation2 + $0x3c8] sm:$0xff]  ;;  %v169_v25 = vld [vmem:[#allocation2 + $0x490] sm:$0xff] }
  0x2c   :  { %v339_v31 = vadd.f32 %v338_v22, %v337_v19  ;;  %v477_v18 = vadd.f32 %v476_v5, %v475_v10  ;;  %v110_v19 = vld [vmem:[#allocation2 + $0x2b8] sm:$0xff]  ;;  %v480_v22 = vsel %vm239_vm0, %v136_v8, 0.0  ;;  %v111_v35 = vld [vmem:[#allocation2 + $0x2c0] sm:$0xff]  ;;  %vm723_vm6 = vcmask 783360  }
  0x2d   :  { %v412_v54 = vadd.f32 %v411_v40, %v410_v46  ;;  %v266_v55 = vadd.f32 %v265_v44, %v264_v39  ;;  %v423_v33 = vsel %vm239_vm0, %v110_v19, 0.0  ;;  %v40_v39 = vld [vmem:[#allocation2 + $0x88] sm:$0xff]  ;;  %v486_v44 = vsel %vm239_vm0, %v139_v30, 0.0  ;;  %v42_v5 = vld [vmem:[#allocation2 + $0x98] sm:$0xff] }
  0x2e   :  { %v341_v45 = vadd.f32 %v340_v34, %v339_v31  ;;  %v479_v27 = vadd.f32 %v478_v13, %v477_v18  ;;  %v76_v40 = vld [vmem:[#allocation2 + $0x1a8] sm:$0xff]  ;;  %v425_v48 = vsel %vm239_vm0, %v111_v35, 0.0  ;;  %v273_v51 = vsel %vm239_vm0, %v40_v39, 0.0  ;;  %v167_v13 = vld [vmem:[#allocation2 + $0x480] sm:$0xff]  ;;  %v114_v19 = vld [vmem:[#allocation2 + $0x2d8] sm:$0xff] }
  0x2f   :  { %v414_v63 = vadd.f32 %v413_v50, %v412_v54  ;;  %v268_v11 = vadd.f32 %v267_v61, %v266_v55  ;;  %v112_v50 = vld [vmem:[#allocation2 + $0x2c8] sm:$0xff]  ;;  %v350_v52 = vsel %vm239_vm0, %v76_v40, 0.0  ;;  %v41_v54 = vld [vmem:[#allocation2 + $0x90] sm:$0xff]  ;;  %v171_v39 = vld [vmem:[#allocation2 + $0x4a0] sm:$0xff]  ;;  %v356_v40 = vsel %vm239_vm0, %v79_v23, 0.0 }
  0x30   :  { %v343_v62 = vadd.f32 %v342_v49, %v341_v45  ;;  %v481_v34 = vadd.f32 %v480_v22, %v479_v27  ;;  %v141_v45 = vld [vmem:[#allocation2 + $0x3b0] sm:$0xff]  ;;  %v496_v22 = vsel %vm239_vm0, %v144_v7, 0.0  ;;  %v82_v23 = vld [vmem:[#allocation2 + $0x1d8] sm:$0xff] }
  0x31   :  { %v416_v9 = vadd.f32 %v415_v56, %v414_v63  ;;  %v270_v28 = vadd.f32 %v269_v15, %v268_v11  ;;  %v77_v55 = vld [vmem:[#allocation2 + $0x1b0] sm:$0xff]  ;;  %v142_v56 = vld [vmem:[#allocation2 + $0x3b8] sm:$0xff]  ;;  %v490_v59 = vsel %vm239_vm0, %v141_v45, 0.0  ;;  %v427_v63 = vsel %vm239_vm0, %v112_v50, 0.0  ;;  %v80_v45 = vld [vmem:[#allocation2 + $0x1c8] sm:$0xff] }
  0x32   :  { %v345_v16 = vadd.f32 %v344_v2, %v343_v62  ;;  %v483_v42 = vadd.f32 %v482_v29, %v481_v34  ;;  %v275_v2 = vsel %vm239_vm0, %v41_v54, 0.0  ;;  %v492_v4 = vsel %vm239_vm0, %v142_v56, 0.0  ;;  %v147_v34 = vld [vmem:[#allocation2 + $0x3e0] sm:$0xff]  ;;  %v116_v54 = vld [vmem:[#allocation2 + $0x2e8] sm:$0xff] }
  0x33   :  { %v418_v17 = vadd.f32 %v417_v3, %v416_v9  ;;  %v272_v46 = vadd.f32 %v271_v36, %v270_v28  ;;  %v352_v3 = vsel %vm239_vm0, %v77_v55, 0.0  ;;  %v43_v9 = vld [vmem:[#allocation2 + $0xa0] sm:$0xff]  ;;  %v494_v11 = vsel %vm239_vm0, %v143_v60, 0.0  ;;  %v170_v28 = vld [vmem:[#allocation2 + $0x498] sm:$0xff]  ;;  %v149_v55 = vld [vmem:[#allocation2 + $0x3f0] sm:$0xff] }
  0x34   :  { %v347_v31 = vadd.f32 %v346_v20, %v345_v16  ;;  %v485_v49 = vadd.f32 %v484_v38, %v483_v42  ;;  %v277_v20 = vsel %vm239_vm0, %v42_v5, 0.0  ;;  %v173_v60 = vld [vmem:[#allocation2 + $0x4b0] sm:$0xff] }
  0x35   :  { %v420_v26 = vadd.f32 %v419_v12, %v418_v17  ;;  %v274_v61 = vadd.f32 %v273_v51, %v272_v46  ;;  %v145_v12 = vld [vmem:[#allocation2 + $0x3d0] sm:$0xff]  ;;  %v429_v17 = vsel %vm239_vm0, %v113_v1, 0.0  ;;  %v148_v46 = vld [vmem:[#allocation2 + $0x3e8] sm:$0xff] }
  0x36   :  { %v349_v47 = vadd.f32 %v348_v37, %v347_v31  ;;  %v487_v57 = vadd.f32 %v486_v44, %v485_v49  ;;  %v498_v30 = vsel %vm239_vm0, %v145_v12, 0.0  ;;  %v548_v31 = vsel %vm239_vm0, %v167_v13, 0.0  ;;  %v44_v44 = vld [vmem:[#allocation2 + $0xa8] sm:$0xff]  ;;  %v45_v1 = vld [vmem:[#allocation2 + $0xb0] sm:$0xff]  ;;  %v151_v12 = vld [vmem:[#allocation2 + $0x400] sm:$0xff] }
  0x37   :  { %v422_v32 = vadd.f32 %v421_v21, %v420_v26  ;;  %v276_v15 = vadd.f32 %v275_v2, %v274_v61  ;;  %v354_v21 = vsel %vm239_vm0, %v78_v6, 0.0  ;;  %v279_v26 = vsel %vm239_vm0, %v43_v9, 0.0  ;;  %v172_v49 = vld [vmem:[#allocation2 + $0x4a8] sm:$0xff]  ;;  %v81_v2 = vld [vmem:[#allocation2 + $0x1d0] sm:$0xff]  ;;  %v174_v6 = vld [vmem:[#allocation2 + $0x4b8] sm:$0xff] }
  0x38   :  { %v351_v62 = vadd.f32 %v350_v52, %v349_v47  ;;  %v489_v0 = vadd.f32 %v488_v53, %v487_v57  ;;  %v431_v37 = vsel %vm239_vm0, %v114_v19, 0.0  ;;  %v502_v52 = vsel %vm239_vm0, %v147_v34, 0.0 }
  0x39   :  { %v424_v43 = vadd.f32 %v423_v33, %v422_v32  ;;  %v549_v32 = vsel %vm239_vm0, %v168_v14, 0.0  ;;  %v115_v33 = vld [vmem:[#allocation2 + $0x2e0] sm:$0xff]  ;;  %v278_v35 = vadd.f32 %v277_v20, %v276_v15  ;;  %v281_v61 = vsel %vm239_vm0, %v44_v44, 0.0 }
  0x3a   :  { %v491_v8 = vadd.f32 %v490_v59, %v489_v0  ;;  %v353_v16 = vadd.f32 %v352_v3, %v351_v62  ;;  %v550_v42 = vadd.f32 %v549_v32, %v548_v31  ;;  %v433_v51 = vsel %vm239_vm0, %v115_v33, 0.0  ;;  %v150_v3 = vld [vmem:[#allocation2 + $0x3f8] sm:$0xff]  ;;  %v153_v33 = vld [vmem:[#allocation2 + $0x410] sm:$0xff]  ;;  %v83_v44 = vld [vmem:[#allocation2 + $0x1e0] sm:$0xff] }
  0x3b   :  { %v426_v58 = vadd.f32 %v425_v48, %v424_v43  ;;  %v551_v43 = vsel %vm239_vm0, %v169_v25, 0.0  ;;  %v553_v48 = vsel %vm239_vm0, %v170_v28, 0.0  ;;  %v280_v56 = vadd.f32 %v279_v26, %v278_v35  ;;  %v118_v32 = vld [vmem:[#allocation2 + $0x2f8] sm:$0xff] }
  0x3c   :  { %v493_v18 = vadd.f32 %v492_v4, %v491_v8  ;;  %v355_v36 = vadd.f32 %v354_v21, %v353_v16  ;;  %v552_v53 = vadd.f32 %v551_v43, %v550_v42  ;;  %v555_v59 = vsel %vm239_vm0, %v171_v39, 0.0  ;;  %v47_v43 = vld [vmem:[#allocation2 + $0xc0] sm:$0xff] }
  0x3d   :  { %v428_v10 = vadd.f32 %v427_v63, %v426_v58  ;;  %v358_v62 = vsel %vm239_vm0, %v80_v45, 0.0  ;;  %v504_v63 = vsel %vm239_vm0, %v148_v46, 0.0  ;;  %v557_v5 = vsel %vm239_vm0, %v172_v49, 0.0 }
  0x3e   :  { %v495_v27 = vadd.f32 %v494_v11, %v493_v18  ;;  %v357_v57 = vadd.f32 %v356_v40, %v355_v36  ;;  %v554_v0 = vadd.f32 %v553_v48, %v552_v53  ;;  %v435_v8 = vsel %vm239_vm0, %v116_v54, 0.0  ;;  %v117_v11 = vld [vmem:[#allocation2 + $0x2f0] sm:$0xff]  ;;  %v178_v48 = vld [vmem:[#allocation2 + $0x4d8] sm:$0xff]  ;;  %v84_v53 = vld [vmem:[#allocation2 + $0x1e8] sm:$0xff] }
  0x3f   :  { %v430_v29 = vadd.f32 %v429_v17, %v428_v10  ;;  %v506_v9 = vsel %vm239_vm0, %v149_v55, 0.0  ;;  %v282_v13 = vadd.f32 %v281_v61, %v280_v56  ;;  %v559_v16 = vsel %vm239_vm0, %v173_v60, 0.0  ;;  %v175_v17 = vld [vmem:[#allocation2 + $0x4c0] sm:$0xff]  ;;  %v154_v54 = vld [vmem:[#allocation2 + $0x418] sm:$0xff] }
  0x40   :  { %v497_v38 = vadd.f32 %v496_v22, %v495_v27  ;;  %v556_v10 = vadd.f32 %v555_v59, %v554_v0  ;;  %v359_v14 = vadd.f32 %v358_v62, %v357_v57  ;;  %v283_v18 = vsel %vm239_vm0, %v45_v1, 0.0  ;;  %v46_v22 = vld [vmem:[#allocation2 + $0xb8] sm:$0xff]  ;;  %v176_v27 = vld [vmem:[#allocation2 + $0x4c8] sm:$0xff]  ;;  %v119_v59 = vld [vmem:[#allocation2 + $0x300] sm:$0xff] }
  0x41   :  { %v432_v50 = vadd.f32 %v431_v37, %v430_v29  ;;  %v360_v19 = vsel %vm239_vm0, %v81_v2, 0.0  ;;  %v508_v20 = vsel %vm239_vm0, %v150_v3, 0.0  ;;  %v561_v26 = vsel %vm239_vm0, %v174_v6, 0.0  ;;  %v179_v60 = vld [vmem:[#allocation2 + $0x4e0] sm:$0xff]  ;;  %v204_v1 = vld [vmem:[#allocation2 + $0x5a8] sm:$0xff]  ;;  %v205_v2 = vld [vmem:[#allocation2 + $0x5b0] sm:$0xff] }
  0x42   :  { %v499_v47 = vadd.f32 %v498_v30, %v497_v38  ;;  %v558_v21 = vadd.f32 %v557_v5, %v556_v10  ;;  %v437_v29 = vsel %vm239_vm0, %v117_v11, 0.0  ;;  %v510_v30 = vsel %vm239_vm0, %v151_v12, 0.0  ;;  %v177_v38 = vld [vmem:[#allocation2 + $0x4d0] sm:$0xff]  ;;  %v203_v0 = vld [vmem:[#allocation2 + $0x5a0] sm:$0xff]  ;;  %v120_v6 = vld [vmem:[#allocation2 + $0x308] sm:$0xff] }
  0x43   :  { %v434_v7 = vadd.f32 %v433_v51, %v432_v50  ;;  %v284_v34 = vadd.f32 %v283_v18, %v282_v13  ;;  %v361_v35 = vadd.f32 %v360_v19, %v359_v14  ;;  %v563_v37 = vsel %vm239_vm0, %v175_v17, 0.0  ;;  %v155_v12 = vld [vmem:[#allocation2 + $0x420] sm:$0xff]  ;;  %v206_v13 = vld [vmem:[#allocation2 + $0x5b8] sm:$0xff]  ;;  %v181_v18 = vld [vmem:[#allocation2 + $0x4f0] sm:$0xff] }
  0x44   :  { %v501_v58 = vadd.f32 %v500_v41, %v499_v47  ;;  %v560_v31 = vadd.f32 %v559_v16, %v558_v21  ;;  %v285_v39 = vsel %vm239_vm0, %v46_v22, 0.0  ;;  %v362_v40 = vsel %vm239_vm0, %v82_v23, 0.0  ;;  %v48_v47 = vld [vmem:[#allocation2 + $0xc8] sm:$0xff]  ;;  %v49_v23 = vld [vmem:[#allocation2 + $0xd0] sm:$0xff] }
  0x45   :  { %v436_v28 = vadd.f32 %v435_v8, %v434_v7  ;;  %v512_v41 = vsel %vm239_vm0, %v152_v24, 0.0  ;;  %v565_v46 = vsel %vm239_vm0, %v176_v27, 0.0  ;;  %v439_v50 = vsel %vm239_vm0, %v118_v32, 0.0  ;;  %v180_v7 = vld [vmem:[#allocation2 + $0x4e8] sm:$0xff]  ;;  %v85_v24 = vld [vmem:[#allocation2 + $0x1f0] sm:$0xff] }
  0x46   :  { %v503_v4 = vadd.f32 %v502_v52, %v501_v58  ;;  %v562_v42 = vadd.f32 %v561_v26, %v560_v31  ;;  %v514_v51 = vsel %vm239_vm0, %v153_v33, 0.0  ;;  %v286_v55 = vadd.f32 %v285_v39, %v284_v34  ;;  %v182_v31 = vld [vmem:[#allocation2 + $0x4f8] sm:$0xff] }
  0x47   :  { %v438_v49 = vadd.f32 %v437_v29, %v436_v28  ;;  %v363_v56 = vadd.f32 %v362_v40, %v361_v35  ;;  %v567_v58 = vsel %vm239_vm0, %v177_v38, 0.0  ;;  %v287_v61 = vsel %vm239_vm0, %v47_v43, 0.0 }
  0x48   :  { %v505_v15 = vadd.f32 %v504_v63, %v503_v4  ;;  %v564_v52 = vadd.f32 %v563_v37, %v562_v42  ;;  %v364_v62 = vsel %vm239_vm0, %v83_v44, 0.0  ;;  %v289_v3 = vsel %vm239_vm0, %v48_v47, 0.0  ;;  %v208_v37 = vld [vmem:[#allocation2 + $0x5c8] sm:$0xff]  ;;  %v183_v42 = vld [vmem:[#allocation2 + $0x500] sm:$0xff]  ;;  %v50_v47 = vld [vmem:[#allocation2 + $0xd8] sm:$0xff] }
  0x49   :  { %v569_v5 = vsel %vm239_vm0, %v178_v48, 0.0  ;;  %v366_v8 = vsel %vm239_vm0, %v84_v53, 0.0  ;;  %v516_v10 = vsel %vm239_vm0, %v154_v54, 0.0  ;;  %v288_v14 = vadd.f32 %v287_v61, %v286_v55  ;;  %v86_v48 = vld [vmem:[#allocation2 + $0x1f8] sm:$0xff]  ;;  %v184_v55 = vld [vmem:[#allocation2 + $0x508] sm:$0xff] }
  0x4a   :  { %v507_v25 = vadd.f32 %v506_v9, %v505_v15  ;;  %v566_v63 = vadd.f32 %v565_v46, %v564_v52  ;;  %v440_v9 = vadd.f32 %v439_v50, %v438_v49  ;;  %v365_v15 = vadd.f32 %v364_v62, %v363_v56  ;;  %v209_v49 = vld [vmem:[#allocation2 + $0x5d0] sm:$0xff]  ;;  %v122_v54 = vld [vmem:[#allocation2 + $0x318] sm:$0xff] }
  0x4b   :  { %v441_v16 = vsel %vm239_vm0, %v119_v59, 0.0  ;;  %v571_v17 = vsel %vm239_vm0, %v179_v60, 0.0  ;;  %v626_v21 = vsel %vm239_vm0, %v204_v1, 0.0  ;;  %v628_v22 = vsel %vm239_vm0, %v205_v2, 0.0  ;;  %v157_v60 = vld [vmem:[#allocation2 + $0x430] sm:$0xff]  ;;  %v210_v61 = vld [vmem:[#allocation2 + $0x5d8] sm:$0xff] }
  0x4c   :  { %v509_v36 = vadd.f32 %v508_v20, %v507_v25  ;;  %v568_v11 = vadd.f32 %v567_v58, %v566_v63  ;;  %v625_v20 = vsel %vm239_vm0, %v203_v0, 0.0  ;;  %v207_v25 = vld [vmem:[#allocation2 + $0x5c0] sm:$0xff]  ;;  %v443_v26 = vsel %vm239_vm0, %v120_v6, 0.0  ;;  %v185_v2 = vld [vmem:[#allocation2 + $0x510] sm:$0xff] }
  0x4d   :  { %v573_v28 = vsel %vm239_vm0, %v180_v7, 0.0  ;;  %v627_v29 = vadd.f32 %v626_v21, %v625_v20  ;;  %v442_v32 = vadd.f32 %v441_v16, %v440_v9  ;;  %v518_v33 = vsel %vm239_vm0, %v155_v12, 0.0  ;;  %v51_v7 = vld [vmem:[#allocation2 + $0xe0] sm:$0xff]  ;;  %v158_v20 = vld [vmem:[#allocation2 + $0x438] sm:$0xff]  ;;  %v212_v21 = vld [vmem:[#allocation2 + $0x5e8] sm:$0xff] }
  0x4e   :  { %v511_v45 = vadd.f32 %v510_v30, %v509_v36  ;;  %v570_v19 = vadd.f32 %v569_v5, %v568_v11  ;;  %v121_v30 = vld [vmem:[#allocation2 + $0x310] sm:$0xff]  ;;  %v630_v35 = vsel %vm239_vm0, %v206_v13, 0.0  ;;  %v156_v36 = vld [vmem:[#allocation2 + $0x428] sm:$0xff]  ;;  %v290_v38 = vadd.f32 %v289_v3, %v288_v14  ;;  %v211_v9 = vld [vmem:[#allocation2 + $0x5e0] sm:$0xff] }
  0x4f   :  { %v367_v39 = vadd.f32 %v366_v8, %v365_v15  ;;  %v575_v40 = vsel %vm239_vm0, %v181_v18, 0.0  ;;  %v291_v43 = vsel %vm239_vm0, %v49_v23, 0.0  ;;  %v368_v44 = vsel %vm239_vm0, %v85_v24, 0.0  ;;  %v87_v8 = vld [vmem:[#allocation2 + $0x200] sm:$0xff]  ;;  %v186_v15 = vld [vmem:[#allocation2 + $0x518] sm:$0xff] }
  0x50   :  { %v513_v57 = vadd.f32 %v512_v41, %v511_v45  ;;  %v572_v34 = vadd.f32 %v571_v17, %v570_v19  ;;  %v629_v41 = vadd.f32 %v628_v22, %v627_v29  ;;  %v632_v46 = vsel %vm239_vm0, %v207_v25, 0.0  ;;  %v123_v14 = vld [vmem:[#allocation2 + $0x320] sm:$0xff] }
  0x51   :  { %v445_v50 = vsel %vm239_vm0, %v121_v30, 0.0  ;;  %v577_v52 = vsel %vm239_vm0, %v182_v31, 0.0  ;;  %v444_v56 = vadd.f32 %v443_v26, %v442_v32  ;;  %v634_v59 = vsel %vm239_vm0, %v208_v37, 0.0  ;;  %v187_v26 = vld [vmem:[#allocation2 + $0x520] sm:$0xff]  ;;  %v52_v31 = vld [vmem:[#allocation2 + $0xe8] sm:$0xff] }
  0x52   :  { %v515_v4 = vadd.f32 %v514_v51, %v513_v57  ;;  %v574_v45 = vadd.f32 %v573_v28, %v572_v34  ;;  %v631_v53 = vadd.f32 %v630_v35, %v629_v41  ;;  %v520_v57 = vsel %vm239_vm0, %v156_v36, 0.0  ;;  %v88_v32 = vld [vmem:[#allocation2 + $0x208] sm:$0xff] }
  0x53   :  { %v292_v62 = vadd.f32 %v291_v43, %v290_v38  ;;  %v369_v63 = vadd.f32 %v368_v44, %v367_v39  ;;  %v579_v0 = vsel %vm239_vm0, %v183_v42, 0.0  ;;  %v293_v3 = vsel %vm239_vm0, %v50_v47, 0.0  ;;  %v124_v38 = vld [vmem:[#allocation2 + $0x328] sm:$0xff]  ;;  %v159_v44 = vld [vmem:[#allocation2 + $0x440] sm:$0xff] }
  0x54   :  { %v517_v27 = vadd.f32 %v516_v10, %v515_v4  ;;  %v576_v58 = vadd.f32 %v575_v40, %v574_v45  ;;  %v633_v1 = vadd.f32 %v632_v46, %v631_v53  ;;  %v370_v4 = vsel %vm239_vm0, %v86_v48, 0.0  ;;  %v188_v39 = vld [vmem:[#allocation2 + $0x528] sm:$0xff]  ;;  %v214_v45 = vld [vmem:[#allocation2 + $0x5f8] sm:$0xff] }
  0x55   :  { %v636_v6 = vsel %vm239_vm0, %v209_v49, 0.0  ;;  %v447_v10 = vsel %vm239_vm0, %v122_v54, 0.0  ;;  %v581_v12 = vsel %vm239_vm0, %v184_v55, 0.0  ;;  %v446_v16 = vadd.f32 %v445_v50, %v444_v56  ;;  %v189_v50 = vld [vmem:[#allocation2 + $0x530] sm:$0xff] }
  0x56   :  { %v519_v51 = vadd.f32 %v518_v33, %v517_v27  ;;  %v578_v5 = vadd.f32 %v577_v52, %v576_v58  ;;  %v635_v13 = vadd.f32 %v634_v59, %v633_v1  ;;  %v522_v17 = vsel %vm239_vm0, %v157_v60, 0.0  ;;  %v213_v33 = vld [vmem:[#allocation2 + $0x5f0] sm:$0xff] }
  0x57   :  { %v638_v19 = vsel %vm239_vm0, %v210_v61, 0.0  ;;  %v294_v22 = vadd.f32 %v293_v3, %v292_v62  ;;  %v371_v23 = vadd.f32 %v370_v4, %v369_v63  ;;  %v583_v24 = vsel %vm239_vm0, %v185_v2, 0.0  ;;  %v53_v55 = vld [vmem:[#allocation2 + $0xf0] sm:$0xff]  ;;  %v190_v63 = vld [vmem:[#allocation2 + $0x538] sm:$0xff]  ;;  %v160_v4 = vld [vmem:[#allocation2 + $0x448] sm:$0xff] }
  0x58   :  { %v521_v11 = vadd.f32 %v520_v57, %v519_v51  ;;  %v580_v18 = vadd.f32 %v579_v0, %v578_v5  ;;  %v637_v25 = vadd.f32 %v636_v6, %v635_v13  ;;  %v295_v27 = vsel %vm239_vm0, %v51_v7, 0.0  ;;  %v89_v56 = vld [vmem:[#allocation2 + $0x210] sm:$0xff]  ;;  %v215_v57 = vld [vmem:[#allocation2 + $0x600] sm:$0xff]  ;;  %v216_v5 = vld [vmem:[#allocation2 + $0x608] sm:$0xff] }
  0x59   :  { %v372_v28 = vsel %vm239_vm0, %v87_v8, 0.0  ;;  %v640_v30 = vsel %vm239_vm0, %v211_v9, 0.0  ;;  %v449_v34 = vsel %vm239_vm0, %v123_v14, 0.0  ;;  %v585_v36 = vsel %vm239_vm0, %v186_v15, 0.0  ;;  %v125_v62 = vld [vmem:[#allocation2 + $0x330] sm:$0xff]  ;;  %v54_v15 = vld [vmem:[#allocation2 + $0xf8] sm:$0xff] }
  0x5a   :  { %v582_v29 = vadd.f32 %v581_v12, %v580_v18  ;;  %v523_v35 = vadd.f32 %v522_v17, %v521_v11  ;;  %v639_v37 = vadd.f32 %v638_v19, %v637_v25  ;;  %v448_v40 = vadd.f32 %v447_v10, %v446_v16  ;;  %v191_v10 = vld [vmem:[#allocation2 + $0x540] sm:$0xff]  ;;  %v90_v16 = vld [vmem:[#allocation2 + $0x218] sm:$0xff]  ;;  %v217_v17 = vld [vmem:[#allocation2 + $0x610] sm:$0xff] }
  0x5b   :  { %v524_v41 = vsel %vm239_vm0, %v158_v20, 0.0  ;;  %v642_v43 = vsel %vm239_vm0, %v212_v21, 0.0  ;;  %v296_v46 = vadd.f32 %v295_v27, %v294_v22  ;;  %v373_v47 = vadd.f32 %v372_v28, %v371_v23  ;;  %v126_v22 = vld [vmem:[#allocation2 + $0x338] sm:$0xff]  ;;  %v192_v23 = vld [vmem:[#allocation2 + $0x548] sm:$0xff]  ;;  %v161_v28 = vld [vmem:[#allocation2 + $0x450] sm:$0xff] }
  0x5c   :  { %v584_v42 = vadd.f32 %v583_v24, %v582_v29  ;;  %v587_v48 = vsel %vm239_vm0, %v187_v26, 0.0  ;;  %v641_v49 = vadd.f32 %v640_v30, %v639_v37  ;;  %v297_v51 = vsel %vm239_vm0, %v52_v31, 0.0  ;;  %v218_v29 = vld [vmem:[#allocation2 + $0x618] sm:$0xff] }
  0x5d   :  { %v374_v52 = vsel %vm239_vm0, %v88_v32, 0.0  ;;  %v644_v54 = vsel %vm239_vm0, %v213_v33, 0.0  ;;  %v451_v58 = vsel %vm239_vm0, %v124_v38, 0.0  ;;  %v525_v59 = vadd.f32 %v524_v41, %v523_v35  ;;  %v219_v41 = vld [vmem:[#allocation2 + $0x620] sm:$0xff] }
  0x5e   :  { %v586_v53 = vadd.f32 %v585_v36, %v584_v42  ;;  %v589_v60 = vsel %vm239_vm0, %v188_v39, 0.0  ;;  %v643_v61 = vadd.f32 %v642_v43, %v641_v49  ;;  %v450_v0 = vadd.f32 %v449_v34, %v448_v40  ;;  %v193_v34 = vld [vmem:[#allocation2 + $0x550] sm:$0xff]  ;;  %v55_v39 = vld [vmem:[#allocation2 + $0x100] sm:$0xff] }
  0x5f   :  { %v526_v1 = vsel %vm239_vm0, %v159_v44, 0.0  ;;  %v646_v3 = vsel %vm239_vm0, %v214_v45, 0.0  ;;  %v298_v6 = vadd.f32 %v297_v51, %v296_v46  ;;  %v375_v7 = vadd.f32 %v374_v52, %v373_v47  ;;  %v91_v40 = vld [vmem:[#allocation2 + $0x220] sm:$0xff]  ;;  %v194_v47 = vld [vmem:[#allocation2 + $0x558] sm:$0xff] }
  0x60   :  { %v588_v2 = vadd.f32 %v587_v48, %v586_v53  ;;  %v591_v8 = vsel %vm239_vm0, %v189_v50, 0.0  ;;  %v645_v9 = vadd.f32 %v644_v54, %v643_v61  ;;  %v299_v11 = vsel %vm239_vm0, %v53_v55, 0.0  ;;  %v127_v46 = vld [vmem:[#allocation2 + $0x340] sm:$0xff]  ;;  %v162_v52 = vld [vmem:[#allocation2 + $0x458] sm:$0xff]  ;;  %v220_v53 = vld [vmem:[#allocation2 + $0x628] sm:$0xff] }
  0x61   :  { %v376_v12 = vsel %vm239_vm0, %v89_v56, 0.0  ;;  %v648_v14 = vsel %vm239_vm0, %v215_v57, 0.0  ;;  %v453_v18 = vsel %vm239_vm0, %v125_v62, 0.0  ;;  %v527_v19 = vadd.f32 %v526_v1, %v525_v59  ;;  %v221_v1 = vld [vmem:[#allocation2 + $0x630] sm:$0xff] }
  0x62   :  { %v590_v13 = vadd.f32 %v589_v60, %v588_v2  ;;  %v593_v20 = vsel %vm239_vm0, %v190_v63, 0.0  ;;  %v647_v21 = vadd.f32 %v646_v3, %v645_v9  ;;  %v452_v24 = vadd.f32 %v451_v58, %v450_v0  ;;  %v195_v58 = vld [vmem:[#allocation2 + $0x560] sm:$0xff]  ;;  %v56_v63 = vld [vmem:[#allocation2 + $0x108] sm:$0xff] }
  0x63   :  { %v528_v25 = vsel %vm239_vm0, %v160_v4, 0.0  ;;  %v650_v27 = vsel %vm239_vm0, %v216_v5, 0.0  ;;  %v300_v30 = vadd.f32 %v299_v11, %v298_v6  ;;  %v377_v31 = vadd.f32 %v376_v12, %v375_v7  ;;  %v92_v0 = vld [vmem:[#allocation2 + $0x228] sm:$0xff]  ;;  %v163_v12 = vld [vmem:[#allocation2 + $0x460] sm:$0xff] }
  0x64   :  { %v592_v26 = vadd.f32 %v591_v8, %v590_v13  ;;  %v595_v32 = vsel %vm239_vm0, %v191_v10, 0.0  ;;  %v649_v33 = vadd.f32 %v648_v14, %v647_v21  ;;  %v301_v35 = vsel %vm239_vm0, %v54_v15, 0.0  ;;  %v128_v6 = vld [vmem:[#allocation2 + $0x348] sm:$0xff]  ;;  %v222_v13 = vld [vmem:[#allocation2 + $0x638] sm:$0xff] }
  0x65   :  { %v378_v36 = vsel %vm239_vm0, %v90_v16, 0.0  ;;  %v652_v38 = vsel %vm239_vm0, %v217_v17, 0.0  ;;  %v455_v42 = vsel %vm239_vm0, %v126_v22, 0.0  ;;  %v529_v43 = vadd.f32 %v528_v25, %v527_v19  ;;  %v196_v7 = vld [vmem:[#allocation2 + $0x568] sm:$0xff]  ;;  %v223_v25 = vld [vmem:[#allocation2 + $0x640] sm:$0xff] }
  0x66   :  { %v594_v37 = vadd.f32 %v593_v20, %v592_v26  ;;  %v597_v44 = vsel %vm239_vm0, %v192_v23, 0.0  ;;  %v651_v45 = vadd.f32 %v650_v27, %v649_v33  ;;  %v454_v48 = vadd.f32 %v453_v18, %v452_v24  ;;  %v197_v18 = vld [vmem:[#allocation2 + $0x570] sm:$0xff] }
  0x67   :  { %v530_v49 = vsel %vm239_vm0, %v161_v28, 0.0  ;;  %v654_v51 = vsel %vm239_vm0, %v218_v29, 0.0  ;;  %v302_v54 = vadd.f32 %v301_v35, %v300_v30  ;;  %v379_v55 = vadd.f32 %v378_v36, %v377_v31  ;;  %v57_v23 = vld [vmem:[#allocation2 + $0x110] sm:$0xff]  ;;  %v198_v31 = vld [vmem:[#allocation2 + $0x578] sm:$0xff]  ;;  %v164_v36 = vld [vmem:[#allocation2 + $0x468] sm:$0xff] }
  0x68   :  { %v596_v50 = vadd.f32 %v595_v32, %v594_v37  ;;  %v599_v56 = vsel %vm239_vm0, %v193_v34, 0.0  ;;  %v653_v57 = vadd.f32 %v652_v38, %v651_v45  ;;  %v303_v59 = vsel %vm239_vm0, %v55_v39, 0.0  ;;  %v93_v24 = vld [vmem:[#allocation2 + $0x230] sm:$0xff]  ;;  %v224_v37 = vld [vmem:[#allocation2 + $0x648] sm:$0xff] }
  0x69   :  { %v380_v60 = vsel %vm239_vm0, %v91_v40, 0.0  ;;  %v656_v62 = vsel %vm239_vm0, %v219_v41, 0.0  ;;  %v457_v2 = vsel %vm239_vm0, %v127_v46, 0.0  ;;  %v531_v3 = vadd.f32 %v530_v49, %v529_v43  ;;  %v129_v30 = vld [vmem:[#allocation2 + $0x350] sm:$0xff] }
  0x6a   :  { %v598_v61 = vadd.f32 %v597_v44, %v596_v50  ;;  %v601_v4 = vsel %vm239_vm0, %v194_v47, 0.0  ;;  %v655_v5 = vadd.f32 %v654_v51, %v653_v57  ;;  %v456_v8 = vadd.f32 %v455_v42, %v454_v48  ;;  %v199_v42 = vld [vmem:[#allocation2 + $0x580] sm:$0xff]  ;;  %v58_v47 = vld [vmem:[#allocation2 + $0x118] sm:$0xff]  ;;  %v225_v49 = vld [vmem:[#allocation2 + $0x650] sm:$0xff] }
  0x6b   :  { %v532_v9 = vsel %vm239_vm0, %v162_v52, 0.0  ;;  %v658_v11 = vsel %vm239_vm0, %v220_v53, 0.0  ;;  %v304_v14 = vadd.f32 %v303_v59, %v302_v54  ;;  %v381_v15 = vadd.f32 %v380_v60, %v379_v55  ;;  %v94_v48 = vld [vmem:[#allocation2 + $0x238] sm:$0xff]  ;;  %v200_v54 = vld [vmem:[#allocation2 + $0x588] sm:$0xff]  ;;  %v165_v59 = vld [vmem:[#allocation2 + $0x470] sm:$0xff] }
  0x6c   :  { %v600_v10 = vadd.f32 %v599_v56, %v598_v61  ;;  %v603_v16 = vsel %vm239_vm0, %v195_v58, 0.0  ;;  %v657_v17 = vadd.f32 %v656_v62, %v655_v5  ;;  %v305_v19 = vsel %vm239_vm0, %v56_v63, 0.0  ;;  %v226_v60 = vld [vmem:[#allocation2 + $0x658] sm:$0xff] }
  0x6d   :  { %v382_v20 = vsel %vm239_vm0, %v92_v0, 0.0  ;;  %v660_v22 = vsel %vm239_vm0, %v221_v1, 0.0  ;;  %v459_v26 = vsel %vm239_vm0, %v128_v6, 0.0  ;;  %v533_v27 = vadd.f32 %v532_v9, %v531_v3  ;;  %v130_v1 = vld [vmem:[#allocation2 + $0x358] sm:$0xff]  ;;  %v227_v6 = vld [vmem:[#allocation2 + $0x660] sm:$0xff] }
  0x6e   :  { %v602_v21 = vadd.f32 %v601_v4, %v600_v10  ;;  %v605_v28 = vsel %vm239_vm0, %v196_v7, 0.0  ;;  %v659_v29 = vadd.f32 %v658_v11, %v657_v17  ;;  %v458_v32 = vadd.f32 %v457_v2, %v456_v8  ;;  %v201_v10 = vld [vmem:[#allocation2 + $0x590] sm:$0xff] }
  0x6f   :  { %v534_v33 = vsel %vm239_vm0, %v163_v12, 0.0  ;;  %v662_v35 = vsel %vm239_vm0, %v222_v13, 0.0  ;;  %v306_v38 = vadd.f32 %v305_v19, %v304_v14  ;;  %v383_v39 = vadd.f32 %v382_v20, %v381_v15  ;;  %v166_v15 = vld [vmem:[#allocation2 + $0x478] sm:$0xff] }
  0x70   :  { %v604_v34 = vadd.f32 %v603_v16, %v602_v21  ;;  %v607_v40 = vsel %vm239_vm0, %v197_v18, 0.0  ;;  %v661_v41 = vadd.f32 %v660_v22, %v659_v29  ;;  %v307_v43 = vsel %vm239_vm0, %v57_v23, 0.0  ;;  %v228_v16 = vld [vmem:[#allocation2 + $0x668] sm:$0xff]  ;;  %v229_v23 = vld [vmem:[#allocation2 + $0x670] sm:$0xff] }
  0x71   :  { %v384_v44 = vsel %vm239_vm0, %v93_v24, 0.0  ;;  %v664_v46 = vsel %vm239_vm0, %v223_v25, 0.0  ;;  %v461_v50 = vsel %vm239_vm0, %v129_v30, 0.0  ;;  %v535_v51 = vadd.f32 %v534_v33, %v533_v27  ;;  %v202_v27 = vld [vmem:[#allocation2 + $0x598] sm:$0xff] }
  0x72   :  { %v606_v45 = vadd.f32 %v605_v28, %v604_v34  ;;  %v609_v52 = vsel %vm239_vm0, %v198_v31, 0.0  ;;  %v663_v53 = vadd.f32 %v662_v35, %v661_v41  ;;  %v460_v55 = vadd.f32 %v459_v26, %v458_v32  ;;  %v230_v31 = vld [vmem:[#allocation2 + $0x678] sm:$0xff] }
  0x73   :  { %v536_v56 = vsel %vm239_vm0, %v164_v36, 0.0  ;;  %v666_v58 = vsel %vm239_vm0, %v224_v37, 0.0  ;;  %v308_v61 = vadd.f32 %v307_v43, %v306_v38  ;;  %v385_v62 = vadd.f32 %v384_v44, %v383_v39  ;;  %v231_v37 = vld [vmem:[#allocation2 + $0x680] sm:$0xff]  ;;  %v232_v43 = vld [vmem:[#allocation2 + $0x688] sm:$0xff] }
  0x74   :  { %v608_v57 = vadd.f32 %v607_v40, %v606_v45  ;;  %v611_v63 = vsel %vm239_vm0, %v199_v42, 0.0  ;;  %v665_v0 = vadd.f32 %v664_v46, %v663_v53  ;;  %v309_v2 = vsel %vm239_vm0, %v58_v47, 0.0 }
  0x75   :  { %v386_v3 = vsel %vm239_vm0, %v94_v48, 0.0  ;;  %v668_v5 = vsel %vm239_vm0, %v225_v49, 0.0  ;;  %v537_v7 = vadd.f32 %v536_v56, %v535_v51  ;;  %v613_v8 = vsel %vm239_vm0, %v200_v54, 0.0  ;;  %v233_v49 = vld [vmem:[#allocation2 + $0x690] sm:$0xff]  ;;  %v234_v54 = vld [vmem:[#allocation2 + $0x698] sm:$0xff] }
  0x76   :  { %v610_v4 = vadd.f32 %v609_v52, %v608_v57  ;;  %v667_v9 = vadd.f32 %v666_v58, %v665_v0  ;;  %v462_v11 = vadd.f32 %v461_v50, %v460_v55  ;;  %v538_v12 = vsel %vm239_vm0, %v165_v59, 0.0 }
  0x77   :  { %v670_v14 = vsel %vm239_vm0, %v226_v60, 0.0  ;;  %v310_v17 = vadd.f32 %v309_v2, %v308_v61  ;;  %v387_v18 = vadd.f32 %v386_v3, %v385_v62  ;;  %v463_v19 = vsel %vm239_vm0, %v130_v1, 0.0  ;;  %v235_v60 = vld [vmem:[#allocation2 + $0x6a0] sm:$0xff]  ;;  %v236_v1 = vld [vmem:[#allocation2 + $0x6a8] sm:$0xff] }
  0x78   :  { %v612_v13 = vadd.f32 %v611_v63, %v610_v4  ;;  %v669_v20 = vadd.f32 %v668_v5, %v667_v9  ;;  %v672_v22 = vsel %vm239_vm0, %v227_v6, 0.0  ;;  %v539_v24 = vadd.f32 %v538_v12, %v537_v7  ;;  %v237_v7 = vld [vmem:[#allocation2 + $0x6b0] sm:$0xff]  ;;  %v238_v12 = vld [vmem:[#allocation2 + $0x6b8] sm:$0xff] }
  0x79   :  { %v615_v25 = vsel %vm239_vm0, %v201_v10, 0.0  ;;  %v464_v28 = vadd.f32 %v463_v19, %v462_v11  ;;  %v540_v29 = vsel %vm239_vm0, %v166_v15, 0.0  ;;  %v674_v30 = vsel %vm239_vm0, %v228_v16, 0.0 }
  0x7a   :  { %v614_v21 = vadd.f32 %v613_v8, %v612_v13  ;;  %v671_v26 = vadd.f32 %v670_v14, %v669_v20  ;;  %v311_v32 = vrot.slane %v310_v17, 4  ;;  %v388_v33 = vrot.slane %v387_v18, 4 }
  0x7b   :  { %v676_v36 = vsel %vm239_vm0, %v229_v23, 0.0  ;;  %v541_v38 = vadd.f32 %v540_v29, %v539_v24  ;;  %v617_v39 = vsel %vm239_vm0, %v202_v27, 0.0  ;;  %v465_v41 = vrot.slane %v464_v28, 4 }
  0x7c   :  { %v673_v34 = vadd.f32 %v672_v22, %v671_v26  ;;  %v616_v35 = vadd.f32 %v615_v25, %v614_v21  ;;  %v678_v42 = vsel %vm239_vm0, %v230_v31, 0.0  ;;  %v312_v44 = vadd.f32 %v311_v32, %v310_v17 }
  0x7d   :  { %v389_v45 = vadd.f32 %v388_v33, %v387_v18  ;;  %v680_v48 = vsel %vm239_vm0, %v231_v37, 0.0  ;;  %v542_v50 = vrot.slane %v541_v38, 4  ;;  %v466_v52 = vadd.f32 %v465_v41, %v464_v28 }
  0x7e   :  { %v675_v40 = vadd.f32 %v674_v30, %v673_v34  ;;  %v618_v47 = vadd.f32 %v617_v39, %v616_v35  ;;  %v682_v53 = vsel %vm239_vm0, %v232_v43, 0.0  ;;  %v313_v55 = vrot.slane %v312_v44, 2 }
  0x7f   :  { %v390_v56 = vrot.slane %v389_v45, 2  ;;  %v684_v59 = vsel %vm239_vm0, %v233_v49, 0.0  ;;  %v543_v61 = vadd.f32 %v542_v50, %v541_v38  ;;  %v467_v63 = vrot.slane %v466_v52, 2 }
  0x80   :  { %v677_v46 = vadd.f32 %v676_v36, %v675_v40  ;;  %v619_v58 = vrot.slane %v618_v47, 4  ;;  %v686_v0 = vsel %vm239_vm0, %v234_v54, 0.0  ;;  %v314_v2 = vadd.f32 %v313_v55, %v312_v44 }
  0x81   :  { %v391_v3 = vadd.f32 %v390_v56, %v389_v45  ;;  %v688_v6 = vsel %vm239_vm0, %v235_v60, 0.0  ;;  %v544_v8 = vrot.slane %v543_v61, 2  ;;  %v468_v10 = vadd.f32 %v467_v63, %v466_v52 }
  0x82   :  { %v679_v51 = vadd.f32 %v678_v42, %v677_v46  ;;  %v620_v5 = vadd.f32 %v619_v58, %v618_v47  ;;  %v690_v11 = vsel %vm239_vm0, %v236_v1, 0.0  ;;  %v315_v13 = vrot.slane %v314_v2, 1 }
  0x83   :  { %v392_v14 = vrot.slane %v391_v3, 1  ;;  %v692_v17 = vsel %vm239_vm0, %v237_v7, 0.0  ;;  %v545_v18 = vadd.f32 %v544_v8, %v543_v61  ;;  %v469_v20 = vrot.slane %v468_v10, 1 }
  0x84   :  { %v681_v57 = vadd.f32 %v680_v48, %v679_v51  ;;  %v621_v16 = vrot.slane %v620_v5, 2  ;;  %v694_v21 = vsel %vm239_vm0, %v238_v12, 0.0  ;;  %v316_v22 = vadd.f32 %v315_v13, %v314_v2 }
  0x85   :  { %v393_v23 = vadd.f32 %v392_v14, %v391_v3  ;;  %v546_v26 = vrot.slane %v545_v18, 1  ;;  %v470_v28 = vadd.f32 %v469_v20, %v468_v10 }
  0x86   :  { %v683_v62 = vadd.f32 %v682_v53, %v681_v57  ;;  %v622_v25 = vadd.f32 %v621_v16, %v620_v5 }
  0x87   :  { %v713_v30 = vsel %vm712_vm1, %v393_v23, %v316_v22  ;;  %v547_v32 = vadd.f32 %v546_v26, %v545_v18 }
  0x88   :  { %v685_v4 = vadd.f32 %v684_v59, %v683_v62  ;;  %v623_v31 = vrot.slane %v622_v25, 1  ;;  %v715_v34 = vsel %vm714_vm2, %v470_v28, %v713_v30 }
  0x89   :  { %v717_v38 = vsel %vm716_vm3, %v547_v32, %v715_v34 }
  0x8a   :  { %v687_v9 = vadd.f32 %v686_v0, %v685_v4  ;;  %v624_v36 = vadd.f32 %v623_v31, %v622_v25 }
  0x8c   :  { %v689_v15 = vadd.f32 %v688_v6, %v687_v9  ;;  %v719_v40 = vsel %vm718_vm4, %v624_v36, %v717_v38 }
  0x8e   :  { %v691_v19 = vadd.f32 %v690_v11, %v689_v15 }
  0x90   :  { %v693_v24 = vadd.f32 %v692_v17, %v691_v19 }
  0x92   :  { %v695_v27 = vadd.f32 %v694_v21, %v693_v24 }
  0x94   :  { %v696_v29 = vrot.slane %v695_v27, 4 }
  0x96   :  { %v697_v33 = vadd.f32 %v696_v29, %v695_v27 }
  0x98   :  { %v698_v35 = vrot.slane %v697_v33, 2 }
  0x9a   :  { %v699_v37 = vadd.f32 %v698_v35, %v697_v33 }
  0x9c   :  { %v700_v39 = vrot.slane %v699_v37, 1 }
  0x9e   :  { %v701_v41 = vadd.f32 %v700_v39, %v699_v37 }
  0xa0   :  { %v721_v42 = vsel %vm720_vm5, %v701_v41, %v719_v40 }
  0xa1   :  { %724 = vst.msk [vmem:[#allocation5] sm:$0x3f] %vm723_vm6, %v721_v42 }
  0xa8   :  { %v753_v43 = vld [vmem:[#allocation5] sm:$0x3f] }
  0xa9   :  { %v754_v44 = vmul.f32 0.0034722222, %v753_v43 }
  0xab   :  { %756 = vst.msk [vmem:[#allocation5] sm:$0x3f] %vm723_vm6, %v754_v44 }
  0xac   :  { %809 = shalt.err (!%p806_p12)
}
  0xad   :  { %s810_s24 = scalar_lea.hbm %s1079_s1, 128 }
  0xae   :  { %p811_p13 = scmp.ne.s32.totalorder %s1079_s1, %s810_s24  ;;  %p814_p0 = scmp.lt.u32.totalorder %s810_s24, %s1079_s1 }
  0xb0   :  { %p816_p1 = pnand %p814_p0, %p811_p13 }
  0xb2   :  { %819 = shalt.err (!%p816_p1)
}
  0xb3   :  { %766 = dma.vmem_to_hbm [thread:$0]  %s764_s20, 128, %s1079_s1, [#allocation4]  }
  0xb4   :  { %822 = dma.done.wait [#allocation4], 128  }
  0xb5   :  { %823 = vsyncadd [#allocation4], 4294967168 }
  0xb6   :  { %770 = vsyncpa [#allocation3], 1 }
  0xb7   :  { %771 = vsyncpa [#allocation4], 1 }

</bundles_post_ra>
